<compile_context>
chip_gen: v6e
topology: v6e:2x2x1
jax: 0.10.0
libtpu: 0.0.40
codegen_flags: <defaults>
</compile_context>

<pallas_src>
import functools

import jax
import jax.numpy as jnp
from jax.experimental import pallas as pl
from jax.experimental.pallas import tpu as pltpu


def _round_up(x, m):
    return (x + m - 1) // m * m


def _sphereface_kernel(scale_ref, cost_ref, phit_ref, cos_ref, loss_ref,
                       m_sc, l_sc, *, num_classes, gamma, ragged):
    # scale_ref : (1,)     f32  SMEM  -- 1 / (1 + lamb), runtime scalar
    # cost_ref  : (bt, 1)  f32* VMEM  -- cos_theta gathered at the target
    # phit_ref  : (bt, 1)  f32* VMEM  -- phi_theta gathered at the target
    # cos_ref   : (bt, ct) f32* VMEM  -- raw cos_theta tile (classes on lanes)
    # loss_ref  : (bt, 1)  f32  VMEM  -- per-row loss (written at last k)
    # m_sc/l_sc : (bt, 1)  f32  scratch -- running max / running sum-exp
    k = pl.program_id(1)
    nk = pl.num_programs(1)

    @pl.when(k == 0)
    def _init():
        m_sc[...] = jnp.full_like(m_sc, -jnp.inf)
        l_sc[...] = jnp.zeros_like(l_sc)

    cos = cos_ref[...].astype(jnp.float32)          # [bt, ct]

    def lse_update(x):
        m_prev = m_sc[...]
        m_new = jnp.maximum(m_prev, jnp.max(x, axis=1, keepdims=True))
        l_sc[...] = jnp.exp(m_prev - m_new) * l_sc[...] + jnp.sum(
            jnp.exp(x - m_new), axis=1, keepdims=True)
        m_sc[...] = m_new

    if ragged:
        # Only the final (partial) class tile contains padded columns; restrict
        # the per-element compare/select to that single tile.
        @pl.when(k < nk - 1)
        def _full_tile():
            lse_update(cos)

        @pl.when(k == nk - 1)
        def _partial_tile():
            bt, ct = cos.shape
            col = jax.lax.broadcasted_iota(jnp.int32, (bt, ct), 1) + k * ct
            lse_update(jnp.where(col < num_classes, cos, jnp.float32(-jnp.inf)))
    else:
        lse_update(cos)

    @pl.when(k == nk - 1)
    def _finalize():
        # Per-row correction: replace the target column's contribution
        # exp(cos_t) in the accumulated denominator by exp(out_t).
        scale = scale_ref[0]
        cos_t = cost_ref[...].astype(jnp.float32)   # [bt, 1]
        phi_t = phit_ref[...].astype(jnp.float32)   # [bt, 1]
        out_t = cos_t + (phi_t - cos_t) * scale
        m_prev = m_sc[...]
        m_f = jnp.maximum(m_prev, out_t)
        l_f = (l_sc[...] * jnp.exp(m_prev - m_f)
               - jnp.exp(cos_t - m_f) + jnp.exp(out_t - m_f))
        logpt = out_t - m_f - jnp.log(l_f)
        if gamma == 0:
            loss_ref[...] = -logpt
        else:
            pt = jnp.exp(logpt)
            loss_ref[...] = -((jnp.float32(1.0) - pt) ** jnp.float32(gamma)) * logpt


@functools.partial(jax.jit, static_argnames=("gamma", "class_tile"))
def sphereface_loss(cos_theta, phi_theta, target, scale, *, gamma=0,
                    class_tile=None):
    """SphereFace focal-style loss. `scale` = 1/(1+lamb) as a runtime scalar."""
    B, C = cos_theta.shape
    target2d = target.reshape(-1, 1).astype(jnp.int32)                  # [B,1]
    # TODO(synk): audit that these minor-axis gathers lower to per-row
    # dynamic-slices (not a one-hot matmul that re-reads B*C from HBM); if hot,
    # fold them into a tiny dedicated Pallas gather kernel.
    phi_t = jnp.take_along_axis(phi_theta, target2d, axis=1)            # [B,1]
    cos_t = jnp.take_along_axis(cos_theta, target2d, axis=1)            # [B,1]

    itemsize = jnp.dtype(cos_theta.dtype).itemsize
    sub = 8 * max(1, 4 // itemsize)      # sublane packing: f32:8, bf16:16, i8:32

    # --- class tile (lane axis) ---------------------------------------------
    if class_tile is not None:
        if class_tile != C and class_tile % 128 != 0:
            raise ValueError(
                "class_tile must equal num_classes or be a multiple of 128")
        ct = class_tile
    elif C <= 4096:
        ct = C
    else:
        ct = 4096
    nc = pl.cdiv(C, ct)
    ragged = (C % ct) != 0

    # --- batch tile (sublane axis) --------------------------------------------
    # Prefer >= 2 batch tiles (so the "parallel" axis shards across v7x's two
    # TensorCores) while keeping the streamed cos block around <= 4 MiB.
    max_block_bytes = 4 << 20
    bt_cap = max(sub, (max_block_bytes // max(ct * itemsize, 1)) // sub * sub)
    bt = _round_up(pl.cdiv(B, 2), sub)
    bt = max(sub, min(bt, 512, bt_cap))
    nb = pl.cdiv(B, bt)
    b_pad = nb * bt

    if b_pad != B:
        # Only the tiny per-row arrays are padded along B.  cos_theta's partial
        # boundary batch block is handled by Pallas; garbage rows there are
        # row-local and discarded by the [:B] slice below.
        cos_t = jnp.pad(cos_t, ((0, b_pad - B), (0, 0)))
        phi_t = jnp.pad(phi_t, ((0, b_pad - B), (0, 0)))

    scale_arr = jnp.asarray(scale, jnp.float32).reshape((1,))

    kernel = functools.partial(_sphereface_kernel, num_classes=C, gamma=gamma,
                               ragged=ragged)

    block_bytes = bt * ct * itemsize
    # Cover double-buffered cos block + small per-row buffers, with headroom;
    # stays well under v7x's 64 MiB physical / 32 MiB scoped default.
    vmem_limit = int(min(32 << 20, max(16 << 20, 2 * block_bytes + (4 << 20))))

    cost = pl.CostEstimate(
        flops=4 * B * C,
        transcendentals=B * C,
        bytes_accessed=B * C * itemsize + b_pad * (3 * itemsize + 4) + 4,
    )

    per_row = pl.pallas_call(
        kernel,
        out_shape=jax.ShapeDtypeStruct((b_pad, 1), jnp.float32),
        grid_spec=pltpu.PrefetchScalarGridSpec(
            num_scalar_prefetch=0,
            grid=(nb, nc),
            in_specs=[
                pl.BlockSpec(memory_space=pltpu.SMEM),           # scale (1,)
                pl.BlockSpec((bt, 1), lambda i, k: (i, 0)),      # cos_t
                pl.BlockSpec((bt, 1), lambda i, k: (i, 0)),      # phi_t
                pl.BlockSpec((bt, ct), lambda i, k: (i, k)),     # cos_theta
            ],
            out_specs=pl.BlockSpec((bt, 1), lambda i, k: (i, 0)),
            scratch_shapes=[
                pltpu.VMEM((bt, 1), jnp.float32),   # running max
                pltpu.VMEM((bt, 1), jnp.float32),   # running sum-exp
            ],
        ),
        compiler_params=pltpu.CompilerParams(
            dimension_semantics=("parallel", "arbitrary"),
            vmem_limit_bytes=vmem_limit,
        ),
        cost_estimate=cost,
    )(scale_arr, cos_t, phi_t, cos_theta)

    # glue: mean over the *real* batch rows only
    return jnp.sum(per_row[:B, 0]) / B


class SphereFacePallas:
    """Stateful wrapper mirroring the PyTorch module's lambda annealing."""

    def __init__(self, gamma=0):
        self.gamma = gamma
        self.it = 0
        self.LambdaMin = 5.0
        self.LambdaMax = 1500.0
        self.lamb = 1500.0

    def __call__(self, inputs, target):
        cos_theta, phi_theta = inputs
        self.it += 1
        self.lamb = max(self.LambdaMin, self.LambdaMax / (1 + 0.1 * self.it))
        # lamb is a *runtime* scalar -> no recompilation across training steps
        scale = jnp.float32(1.0 / (1.0 + self.lamb))
        return sphereface_loss(cos_theta, phi_theta, target, scale,
                               gamma=self.gamma)


def _reference(cos_theta, phi_theta, target, lamb, gamma):
    B, C = cos_theta.shape
    mask = jax.nn.one_hot(target, C, dtype=jnp.bool_)
    out = jnp.where(mask, cos_theta + (phi_theta - cos_theta) / (1.0 + lamb),
                    cos_theta)
    logsm = jax.nn.log_softmax(out, axis=1)
    logpt = jnp.sum(jnp.where(mask, logsm, 0.0), axis=1)
    pt = jnp.exp(logpt)
    return jnp.mean(-1.0 * (1.0 - pt) ** gamma * logpt)


if __name__ == "__main__":
    key = jax.random.PRNGKey(0)
    B, C = 8, 16   # small demo: batch=8, num_classes=16
    k1, k2, k3 = jax.random.split(key, 3)
    cos_theta = jax.random.uniform(k1, (B, C), jnp.float32, -1.0, 1.0)
    # phi_theta is a monotone margin-modified cosine; synthesize a plausible range.
    phi_theta = jax.random.uniform(k2, (B, C), jnp.float32, -2.0, 1.0)
    target = jax.random.randint(k3, (B,), 0, C, jnp.int32)

    # two training steps: lamb changes each step, kernel compiles only once
    loss_mod = SphereFacePallas(gamma=0)
    for _ in range(2):
        loss = jax.block_until_ready(loss_mod((cos_theta, phi_theta), target))
        ref = _reference(cos_theta, phi_theta, target, loss_mod.lamb,
                         loss_mod.gamma)
        assert jnp.allclose(loss, ref, rtol=1e-5, atol=1e-5), (loss, ref)

    # focal branch (gamma != 0)
    loss_mod2 = SphereFacePallas(gamma=2)
    loss2 = jax.block_until_ready(loss_mod2((cos_theta, phi_theta), target))
    ref2 = _reference(cos_theta, phi_theta, target, loss_mod2.lamb, 2)
    assert jnp.allclose(loss2, ref2, rtol=1e-5, atol=1e-5), (loss2, ref2)

    # class-tiled online-softmax path with a ragged final class tile and >= 2
    # batch tiles (exercises the mask-only-last-tile and megacore split paths)
    B2, C2 = 16, 300
    k4, k5, k6 = jax.random.split(jax.random.PRNGKey(1), 3)
    cos2 = jax.random.uniform(k4, (B2, C2), jnp.float32, -1.0, 1.0)
    phi2 = jax.random.uniform(k5, (B2, C2), jnp.float32, -2.0, 1.0)
    tgt2 = jax.random.randint(k6, (B2,), 0, C2, jnp.int32)
    lamb2 = 100.0
    loss3 = jax.block_until_ready(
        sphereface_loss(cos2, phi2, tgt2, jnp.float32(1.0 / (1.0 + lamb2)),
                        gamma=0, class_tile=128))
    ref3 = _reference(cos2, phi2, tgt2, lamb2, 0)
    assert jnp.allclose(loss3, ref3, rtol=1e-5, atol=1e-5), (loss3, ref3)

    print("KERNEL_OK")
</pallas_src>

<mosaic_0001>
module attributes {stable_mosaic.version = 11 : i64} {
  func.func @_sphereface_kernel(%arg0: i32, %arg1: i32, %arg2: memref<1xf32, #tpu.memory_space<smem>>, %arg3: memref<8x1xf32, #tpu.memory_space<vmem>>, %arg4: memref<8x1xf32, #tpu.memory_space<vmem>>, %arg5: memref<8x16xf32, #tpu.memory_space<vmem>>, %arg6: memref<8x1xf32, #tpu.memory_space<vmem>>, %arg7: memref<8x1xf32, #tpu.memory_space<vmem>>, %arg8: memref<8x1xf32, #tpu.memory_space<vmem>>) attributes {dimension_semantics = [#tpu.dimension_semantics<parallel>, #tpu.dimension_semantics<arbitrary>], iteration_bounds = array<i64: 1, 1>, scalar_prefetch = 0 : i64, scratch_operands = 2 : i64, tpu.core_type = #tpu.core_type<tc>, window_params = [{transform_indices = @transform_0, window_bounds = array<i64: 1>}, {transform_indices = @transform_1, window_bounds = array<i64: 8, 1>}, {transform_indices = @transform_2, window_bounds = array<i64: 8, 1>}, {transform_indices = @transform_3, window_bounds = array<i64: 8, 16>}, {transform_indices = @transform_4, window_bounds = array<i64: 8, 1>}]} {
    %c0_i32 = arith.constant 0 : i32
    %0 = arith.cmpi eq, %arg1, %c0_i32 : i32
    %1 = arith.extui %0 : i1 to i32
    %c0_i32_0 = arith.constant 0 : i32
    %2 = arith.cmpi ne, %1, %c0_i32_0 : i32
    scf.if %2 {
      %cst_13 = arith.constant 0xFF800000 : f32
      %23 = vector.broadcast %cst_13 : f32 to vector<8x1xf32>
      %c0_14 = arith.constant 0 : index
      %c0_15 = arith.constant 0 : index
      %24 = vector.load %arg7[%c0_14, %c0_15] : memref<8x1xf32, #tpu.memory_space<vmem>>, vector<8x1xf32>
      tpu.vector_store %arg7[%c0_14, %c0_15], %23 {strides = array<i32>} : memref<8x1xf32, #tpu.memory_space<vmem>>, vector<8x1xf32>,
      %cst_16 = arith.constant 0.000000e+00 : f32
      %25 = vector.broadcast %cst_16 : f32 to vector<8x1xf32>
      %c0_17 = arith.constant 0 : index
      %c0_18 = arith.constant 0 : index
      %26 = vector.load %arg8[%c0_17, %c0_18] : memref<8x1xf32, #tpu.memory_space<vmem>>, vector<8x1xf32>
      tpu.vector_store %arg8[%c0_17, %c0_18], %25 {strides = array<i32>} : memref<8x1xf32, #tpu.memory_space<vmem>>, vector<8x1xf32>,
    } else {
    }
    %c0 = arith.constant 0 : index
    %c0_1 = arith.constant 0 : index
    %3 = vector.load %arg5[%c0, %c0_1] : memref<8x16xf32, #tpu.memory_space<vmem>>, vector<8x16xf32>
    %c0_2 = arith.constant 0 : index
    %c0_3 = arith.constant 0 : index
    %4 = vector.load %arg7[%c0_2, %c0_3] : memref<8x1xf32, #tpu.memory_space<vmem>>, vector<8x1xf32>
    %cst = arith.constant dense<0xFF800000> : vector<8xf32>
    %5 = vector.multi_reduction <maximumf>, %3, %cst [1] : vector<8x16xf32> to vector<8xf32>
    %6 = vector.shape_cast %5 : vector<8xf32> to vector<8x1xf32>
    %7 = arith.maximumf %4, %6 : vector<8x1xf32>
    %8 = arith.subf %4, %7 : vector<8x1xf32>
    %9 = math.exp %8 : vector<8x1xf32>
    %c0_4 = arith.constant 0 : index
    %c0_5 = arith.constant 0 : index
    %10 = vector.load %arg8[%c0_4, %c0_5] : memref<8x1xf32, #tpu.memory_space<vmem>>, vector<8x1xf32>
    %11 = arith.mulf %9, %10 : vector<8x1xf32>
    %12 = vector.broadcast %7 : vector<8x1xf32> to vector<8x16xf32>
    %13 = arith.subf %3, %12 : vector<8x16xf32>
    %14 = math.exp %13 : vector<8x16xf32>
    %cst_6 = arith.constant dense<0.000000e+00> : vector<8xf32>
    %15 = vector.multi_reduction <add>, %14, %cst_6 [1] : vector<8x16xf32> to vector<8xf32>
    %16 = vector.shape_cast %15 : vector<8xf32> to vector<8x1xf32>
    %17 = arith.addf %11, %16 : vector<8x1xf32>
    %c0_7 = arith.constant 0 : index
    %c0_8 = arith.constant 0 : index
    %18 = vector.load %arg8[%c0_7, %c0_8] : memref<8x1xf32, #tpu.memory_space<vmem>>, vector<8x1xf32>
    tpu.vector_store %arg8[%c0_7, %c0_8], %17 {strides = array<i32>} : memref<8x1xf32, #tpu.memory_space<vmem>>, vector<8x1xf32>,
    %c0_9 = arith.constant 0 : index
    %c0_10 = arith.constant 0 : index
    %19 = vector.load %arg7[%c0_9, %c0_10] : memref<8x1xf32, #tpu.memory_space<vmem>>, vector<8x1xf32>
    tpu.vector_store %arg7[%c0_9, %c0_10], %7 {strides = array<i32>} : memref<8x1xf32, #tpu.memory_space<vmem>>, vector<8x1xf32>,
    %c0_i32_11 = arith.constant 0 : i32
    %20 = arith.cmpi eq, %arg1, %c0_i32_11 : i32
    %21 = arith.extui %20 : i1 to i32
    %c0_i32_12 = arith.constant 0 : i32
    %22 = arith.cmpi ne, %21, %c0_i32_12 : i32
    scf.if %22 {
      %c0_13 = arith.constant 0 : index
      %23 = memref.load %arg2[%c0_13] : memref<1xf32, #tpu.memory_space<smem>>
      %c0_14 = arith.constant 0 : index
      %c0_15 = arith.constant 0 : index
      %24 = vector.load %arg3[%c0_14, %c0_15] : memref<8x1xf32, #tpu.memory_space<vmem>>, vector<8x1xf32>
      %c0_16 = arith.constant 0 : index
      %c0_17 = arith.constant 0 : index
      %25 = vector.load %arg4[%c0_16, %c0_17] : memref<8x1xf32, #tpu.memory_space<vmem>>, vector<8x1xf32>
      %26 = arith.subf %25, %24 : vector<8x1xf32>
      %27 = vector.broadcast %23 : f32 to vector<8x1xf32>
      %28 = arith.mulf %26, %27 : vector<8x1xf32>
      %29 = arith.addf %24, %28 : vector<8x1xf32>
      %c0_18 = arith.constant 0 : index
      %c0_19 = arith.constant 0 : index
      %30 = vector.load %arg7[%c0_18, %c0_19] : memref<8x1xf32, #tpu.memory_space<vmem>>, vector<8x1xf32>
      %31 = arith.maximumf %30, %29 : vector<8x1xf32>
      %c0_20 = arith.constant 0 : index
      %c0_21 = arith.constant 0 : index
      %32 = vector.load %arg8[%c0_20, %c0_21] : memref<8x1xf32, #tpu.memory_space<vmem>>, vector<8x1xf32>
      %33 = arith.subf %30, %31 : vector<8x1xf32>
      %34 = math.exp %33 : vector<8x1xf32>
      %35 = arith.mulf %32, %34 : vector<8x1xf32>
      %36 = arith.subf %24, %31 : vector<8x1xf32>
      %37 = math.exp %36 : vector<8x1xf32>
      %38 = arith.subf %35, %37 : vector<8x1xf32>
      %39 = arith.subf %29, %31 : vector<8x1xf32>
      %40 = math.exp %39 : vector<8x1xf32>
      %41 = arith.addf %38, %40 : vector<8x1xf32>
      %42 = arith.subf %29, %31 : vector<8x1xf32>
      %43 = math.log %41 : vector<8x1xf32>
      %44 = arith.subf %42, %43 : vector<8x1xf32>
      %cst_22 = arith.constant 0.000000e+00 : f32
      %45 = vector.broadcast %cst_22 : f32 to vector<8x1xf32>
      %46 = arith.subf %45, %44 : vector<8x1xf32>
      %c0_23 = arith.constant 0 : index
      %c0_24 = arith.constant 0 : index
      %47 = vector.load %arg6[%c0_23, %c0_24] : memref<8x1xf32, #tpu.memory_space<vmem>>, vector<8x1xf32>
      tpu.vector_store %arg6[%c0_23, %c0_24], %46 {strides = array<i32>} : memref<8x1xf32, #tpu.memory_space<vmem>>, vector<8x1xf32>,
    } else {
    }
    return
  }
  func.func @transform_0(%arg0: i32, %arg1: i32) -> i32 {
    %c0_i32 = arith.constant 0 : i32
    %c0_i32_0 = arith.constant 0 : i32
    return %c0_i32 : i32
  }
  func.func @transform_1(%arg0: i32, %arg1: i32) -> (i32, i32) {
    %c0_i32 = arith.constant 0 : i32
    %c0_i32_0 = arith.constant 0 : i32
    return %arg0, %c0_i32 : i32, i32
  }
  func.func @transform_2(%arg0: i32, %arg1: i32) -> (i32, i32) {
    %c0_i32 = arith.constant 0 : i32
    %c0_i32_0 = arith.constant 0 : i32
    return %arg0, %c0_i32 : i32, i32
  }
  func.func @transform_3(%arg0: i32, %arg1: i32) -> (i32, i32) {
    %c0_i32 = arith.constant 0 : i32
    return %arg0, %arg1 : i32, i32
  }
  func.func @transform_4(%arg0: i32, %arg1: i32) -> (i32, i32) {
    %c0_i32 = arith.constant 0 : i32
    %c0_i32_0 = arith.constant 0 : i32
    return %arg0, %c0_i32 : i32, i32
  }
}

</mosaic_0001>

<bundles_post_ra>
// kernel: sphereface_loss.1
= control target key start
LH: loop header
LB: loop body
LE: loop exit
PB: predicated region body
PF: predicated region fallthrough
CT: control target
= control target key end

     0   :  { %vm27_vm0 = vcmask 130048   ;;  %vm22_vm1 = vcmask 7168   ;;  %v102_v1 = vmov -inf   ;;  %v103_v3 = vmov 0   ;;  %s152_s3 = inlined_call_operand.vmem [shape: f32[8,16], index: 3, kind: input, shape index: {}]   ;;  %s153_s1 = inlined_call_operand.vmem [shape: f32[8,1], index: 1, kind: input, shape index: {}]   ;;  %s154_s2 = inlined_call_operand.vmem [shape: f32[8,1], index: 2, kind: input, shape index: {}]   ;;  %s155_s0 = inlined_call_operand.<no memory space> [shape: f32[1], index: 0, kind: input, shape index: {}]   ;;  %s156_s4 = inlined_call_operand.vmem [shape: f32[8,1], index: 4, kind: output, shape index: {}]  }
   0x1   :  { %v25_v0 = vld [vmem:[%s152_s3] sm:$0xff]  ;;  %23 = vst.msk [vmem:[#allocation2] sm:$0xff] %vm22_vm1, %v102_v1  ;;  %89 = vset.pattern.permute.xlu0 %v103_v3  ;;  %v104_v4 = vmov 0.0   ;;  %v59_v17 = vstv %s155_s0 }
   0x2   :  { %v28_v2 = vsel %vm27_vm0, %v25_v0, -inf  ;;  %24 = vst.msk [vmem:[#allocation3] sm:$0xff] %vm22_vm1, %v104_v4  ;;  %v56_v14 = vld [vmem:[%s153_s1] sm:$0xff] }
   0x3   :  { %29 = vmax.xlane.f32.xlu0 %v28_v2  ;;  %v57_v15 = vld [vmem:[%s154_s2] sm:$0xff] }
   0x4   :  { %v58_v16 = vsub.f32 %v57_v15, %v56_v14 }
   0x6   :  { %v60_v18 = vmul.f32 %v59_v17, %v58_v16 }
   0x8   :  { %v26_v5 = vld [vmem:[#allocation2] sm:$0xff]  ;;  %v61_v20 = vadd.f32 %v60_v18, %v56_v14 }
   0x9   :  { %v35_v29 = vld [vmem:[#allocation3] sm:$0xff] }
  0x8c   :  { %v30_v6 = vpop.xlane.xlu0 %29 }
  0x8d   :  { %v31_v7 = vmax.f32 %v26_v5, %v30_v6 }
  0x8f   :  { %v32_v8 = vsub.f32 %v26_v5, %v31_v7  ;;  %51 = vst.msk [vmem:[#allocation2] sm:$0xff] %vm22_vm1, %v31_v7  ;;  %39 = vperm.xlu0 %89, %v31_v7  }
  0x91   :  { %v33_v19 = vmul.f32 1.442695, %v32_v8 }
  0x96   :  { %v62_v21 = vld [vmem:[#allocation2] sm:$0xff] }
  0x97   :  { %v63_v22 = vmax.f32 %v62_v21, %v61_v20 }
  0x99   :  { %v65_v23 = vsub.f32 %v62_v21, %v63_v22  ;;  %v69_v24 = vsub.f32 %v56_v14, %v63_v22  ;;  %v73_v26 = vsub.f32 %v61_v20, %v63_v22 }
  0x9b   :  { %v66_v25 = vmul.f32 1.442695, %v65_v23  ;;  %v70_v27 = vmul.f32 1.442695, %v69_v24  ;;  %v74_v30 = vmul.f32 1.442695, %v73_v26 }
 0x10a   :  { %v40_v9 = vpop.permute.xlu0 %39 }
 0x10b   :  { %v42_v10 = vsub.f32 %v25_v0, %v40_v9 }
 0x10d   :  { %v43_v11 = vmul.f32 1.442695, %v42_v10 }
 0x10f   :  { %90 = vpow2.f32 %v43_v11 }
 0x110   :  { %92 = vpow2.f32 %v33_v19 }
 0x111   :  { %94 = vpow2.f32 %v66_v25 }
 0x112   :  { %96 = vpow2.f32 %v70_v27 }
 0x113   :  { %98 = vpow2.f32 %v74_v30 }
 0x11c   :  { %v91_v12 = vpop.eup %90 }
 0x11d   :  { %v45_v13 = vsel %vm27_vm0, %v91_v12, 0.0  ;;  %v93_v28 = vpop.eup %92 }
 0x11e   :  { %46 = vadd.xlane.f32.xlu1 %v45_v13  ;;  %v36_v31 = vmul.f32 %v93_v28, %v35_v29  ;;  %v95_v34 = vpop.eup %94 }
 0x11f   :  { %v97_v37 = vpop.eup %96 }
 0x120   :  { %v99_v39 = vpop.eup %98 }
 0x1a7   :  { %v47_v32 = vpop.xlane.xlu1 %46 }
 0x1a8   :  { %v48_v33 = vadd.f32 %v47_v32, %v36_v31 }
 0x1aa   :  { %50 = vst.msk [vmem:[#allocation3] sm:$0xff] %vm22_vm1, %v48_v33 }
 0x1b1   :  { %v64_v35 = vld [vmem:[#allocation3] sm:$0xff] }
 0x1b2   :  { %v68_v36 = vmul.f32 %v95_v34, %v64_v35 }
 0x1b4   :  { %v72_v38 = vsub.f32 %v68_v36, %v97_v37 }
 0x1b6   :  { %v76_v40 = vadd.f32 %v99_v39, %v72_v38 }
 0x1b8   :  { %100 = vlog2.f32 %v76_v40 }
 0x1c5   :  { %v101_v41 = vpop.eup %100 }
 0x1c6   :  { %v78_v42 = vmul.f32 0.6931472, %v101_v41 }
 0x1c8   :  { %v79_v43 = vsub.f32 %v73_v26, %v78_v42 }
 0x1ca   :  { %v80_v44 = vsub.f32 0.0, %v79_v43 }
 0x1cc   :  { %81 = vst.msk [vmem:[%s156_s4] sm:$0xff] %vm22_vm1, %v80_v44 }

</bundles_post_ra>
